<compile_context>
chip_gen: v5e
topology: v5e:2x2
jax: 0.10.0
libtpu: 0.0.40
codegen_flags: <defaults>
</compile_context>

<pallas_src>
import jax
import jax.numpy as jnp
from jax.experimental import pallas as pl
from jax.experimental.pallas import tpu as pltpu

OUT_PAD = 8    # decoder logits padded 2 -> 8 (full-dim narrow output block)
LANE = 128     # lane width used for padding vocab / channel dims


def _round_up(x, m):
    return ((x + m - 1) // m) * m


def textcnn_kernel(tok_ref, m_ref, bcp_ref, wd_ref, bd_ref, out_ref):
    # tok_ref: (tb, L)         int32 token ids (only streamed activation input)
    # m_ref:   (L, Vp, Cp)     per-position folded (embedding @ conv+pool) tables
    # bcp_ref: (1, Cp)         conv biases, zero-padded to Cp lanes
    # wd_ref:  (Cp, OUT_PAD)   decoder weight, zero-padded
    # bd_ref:  (1, OUT_PAD)    decoder bias, zero-padded
    # out_ref: (tb, OUT_PAD)   logits (first 2 lanes are real)
    tok = tok_ref[...]
    tb, L = tok.shape
    Vp = m_ref.shape[1]
    Cp = m_ref.shape[2]

    # Hoisted out of the loop (JAX does not CSE broadcasts).
    vocab_iota = jax.lax.broadcasted_iota(jnp.int32, (tb, Vp), 1)

    acc = jnp.zeros((tb, Cp), jnp.float32)
    for s in range(L):  # static unroll; L is small. One MXU matmul per position.
        onehot = (tok[:, s:s + 1] == vocab_iota).astype(jnp.float32)      # (tb, Vp)
        acc = acc + jnp.dot(onehot, m_ref[s], preferred_element_type=jnp.float32)

    pooled = acc + bcp_ref[...]                    # conv bias after the mean (exact)
    enc = jnp.maximum(pooled, 0.0)                 # ReLU; Dropout identity in eval
    out = jnp.dot(enc, wd_ref[...], preferred_element_type=jnp.float32) + bd_ref[...]
    out_ref[...] = out.astype(out_ref.dtype)


def init_params(key, vocab_size, embed_size, kernel_sizes, num_channels):
    keys = jax.random.split(key, 4 + 2 * len(kernel_sizes))
    params = {
        "emb": 0.1 * jax.random.normal(keys[0], (vocab_size, embed_size), jnp.float32),
        "const_emb": 0.1 * jax.random.normal(keys[1], (vocab_size, embed_size), jnp.float32),
        "conv_w": [],
        "conv_b": [],
    }
    c_in = 2 * embed_size
    for i, (c, k) in enumerate(zip(num_channels, kernel_sizes)):
        # PyTorch Conv1d weight is (c_out, c_in, k); stored here as (k, c_in, c_out).
        params["conv_w"].append(
            0.1 * jax.random.normal(keys[2 + 2 * i], (k, c_in, c), jnp.float32))
        params["conv_b"].append(
            0.1 * jax.random.normal(keys[3 + 2 * i], (1, c), jnp.float32))
    sum_c = sum(num_channels)
    dec_w = 0.1 * jax.random.normal(keys[-2], (sum_c, 2), jnp.float32)
    params["dec_w"] = []
    off = 0
    for c in num_channels:
        params["dec_w"].append(dec_w[off:off + c, :])
        off += c
    params["dec_b"] = 0.1 * jax.random.normal(keys[-1], (1, 2), jnp.float32)
    return params


def fold_params(params, kernel_sizes, seq_len):
    """Fold Embedding + Conv1d + AdaptiveAvgPool1d(1) into per-position tables (exact)."""
    L = seq_len
    emb_cat = jnp.concatenate([params["emb"], params["const_emb"]], axis=1)  # (V, 2E)
    V = emb_cat.shape[0]

    w_blocks, b_blocks = [], []
    for w_kec, b in zip(params["conv_w"], params["conv_b"]):
        k = w_kec.shape[0]
        l_out = L - k + 1
        rows = []
        for s in range(L):
            j_lo = max(0, s - l_out + 1)
            j_hi = min(k - 1, s)
            rows.append(jnp.sum(w_kec[j_lo:j_hi + 1], axis=0))     # (2E, c)
        w_blocks.append(jnp.stack(rows, axis=0) / float(l_out))     # (L, 2E, c)
        b_blocks.append(b)
    w_eff = jnp.concatenate(w_blocks, axis=-1)                      # (L, 2E, sum_c)
    b_cp = jnp.concatenate(b_blocks, axis=-1)                       # (1, sum_c)
    sum_c = w_eff.shape[-1]

    # Fold the embedding lookup: M[s, v, c] = sum_e EmbCat[v, e] * W_eff[s, e, c]
    m = jnp.einsum("ve,sec->svc", emb_cat, w_eff)                   # (L, V, sum_c)

    Vp = _round_up(V, LANE)
    Cp = _round_up(sum_c, LANE)
    m_pad = jnp.zeros((L, Vp, Cp), jnp.float32).at[:, :V, :sum_c].set(m)
    b_pad = jnp.zeros((1, Cp), jnp.float32).at[:, :sum_c].set(b_cp)

    dec_w = jnp.concatenate(params["dec_w"], axis=0)                # (sum_c, 2)
    wd = jnp.zeros((Cp, OUT_PAD), jnp.float32).at[:sum_c, :2].set(dec_w)
    bd = jnp.zeros((1, OUT_PAD), jnp.float32).at[:, :2].set(params["dec_b"])
    return m_pad, b_pad, wd, bd


def textcnn_forward(tokens, params, kernel_sizes, block_b=512):
    B, L = tokens.shape
    m, bcp, wd, bd = fold_params(params, kernel_sizes, L)
    Lw, Vp, Cp = m.shape

    # Batch tiling: large tiles amortize the ~0.35us/step overhead; when the batch
    # fits in <=2 tiles, still split into >=2 grid steps (multiple of 8) so that
    # dimension_semantics=("parallel",) can shard across both v7x TensorCores.
    if B <= 8:
        tb = B                                   # full-dim block (legal for any B)
    elif B <= 2 * block_b:
        tb = _round_up(pl.cdiv(B, 2), 8)
    else:
        tb = block_b
    grid = (pl.cdiv(B, tb),)

    flops = 2 * B * L * Vp * Cp + 2 * B * Cp * OUT_PAD
    bytes_accessed = 4 * (B * L + m.size + bcp.size + wd.size + bd.size + B * OUT_PAD)
    ce = pl.CostEstimate(flops=flops, transcendentals=0, bytes_accessed=bytes_accessed)

    out = pl.pallas_call(
        textcnn_kernel,
        out_shape=jax.ShapeDtypeStruct((B, OUT_PAD), jnp.float32),
        grid=grid,
        in_specs=[
            pl.BlockSpec((tb, L), lambda i: (i, 0)),            # tokens: batch-tiled stream
            pl.BlockSpec((Lw, Vp, Cp), lambda i: (0, 0, 0)),    # folded tables: VMEM-resident
            pl.BlockSpec((1, Cp), lambda i: (0, 0)),
            pl.BlockSpec((Cp, OUT_PAD), lambda i: (0, 0)),
            pl.BlockSpec((1, OUT_PAD), lambda i: (0, 0)),
        ],
        out_specs=pl.BlockSpec((tb, OUT_PAD), lambda i: (i, 0)),
        compiler_params=pltpu.CompilerParams(dimension_semantics=("parallel",)),
        cost_estimate=ce,
    )(tokens, m, bcp, wd, bd)
    return out[:, :2]


def textcnn_reference(tokens, params, kernel_sizes):
    # Pure-JAX reference in the original embed -> conv -> mean-pool -> ReLU -> linear order.
    emb = jnp.take(params["emb"], tokens, axis=0)
    cemb = jnp.take(params["const_emb"], tokens, axis=0)
    x = jnp.concatenate([emb, cemb], axis=-1)          # (B, L, 2E)
    B, L, _ = x.shape
    encs = []
    for i, k in enumerate(kernel_sizes):
        w = params["conv_w"][i]                        # (k, 2E, c)
        b = params["conv_b"][i]                        # (1, c)
        l_out = L - k + 1
        conv = sum(
            jnp.einsum("ble,ec->blc", x[:, j:j + l_out, :], w[j])
            for j in range(k)
        )                                              # (B, l_out, c)
        pooled = jnp.mean(conv, axis=1) + b
        encs.append(jnp.maximum(pooled, 0.0))
    enc = jnp.concatenate(encs, axis=1)
    dec_w = jnp.concatenate(params["dec_w"], axis=0)
    return enc @ dec_w + params["dec_b"]


if __name__ == "__main__":
    vocab_size = 50
    embed_size = 16
    seq_len = 16
    kernel_sizes = (3, 4, 5)
    num_channels = (16, 16, 32)

    key = jax.random.PRNGKey(0)
    k_tok1, k_tok2, k_par = jax.random.split(key, 3)
    params = init_params(k_par, vocab_size, embed_size, kernel_sizes, num_channels)

    # Small single-tile case + a multi-tile case (exercises >=2 grid steps and a
    # partial last batch block, whose OOB rows are discarded on store).
    for name, bsz, kk in (("small", 4, k_tok1), ("multi", 40, k_tok2)):
        tokens = jax.random.randint(kk, (bsz, seq_len), 0, vocab_size, dtype=jnp.int32)
        out = jax.block_until_ready(textcnn_forward(tokens, params, kernel_sizes))
        ref = textcnn_reference(tokens, params, kernel_sizes)
        assert out.shape == (bsz, 2)
        assert jnp.allclose(out, ref, atol=1e-4, rtol=1e-4), (
            name, float(jnp.max(jnp.abs(out - ref))))
    print("KERNEL_OK")
</pallas_src>

<mosaic_0001>
module attributes {stable_mosaic.version = 11 : i64} {
  func.func @textcnn_kernel(%arg0: i32, %arg1: memref<4x16xi32, #tpu.memory_space<vmem>>, %arg2: memref<16x128x128xf32, #tpu.memory_space<vmem>>, %arg3: memref<1x128xf32, #tpu.memory_space<vmem>>, %arg4: memref<128x8xf32, #tpu.memory_space<vmem>>, %arg5: memref<1x8xf32, #tpu.memory_space<vmem>>, %arg6: memref<4x8xf32, #tpu.memory_space<vmem>>) attributes {dimension_semantics = [#tpu.dimension_semantics<parallel>], iteration_bounds = array<i64: 1>, scalar_prefetch = 0 : i64, scratch_operands = 0 : i64, tpu.core_type = #tpu.core_type<tc>, window_params = [{transform_indices = @transform_0, window_bounds = array<i64: 4, 16>}, {pipeline_mode = #tpu.pipeline_mode<synchronous>, transform_indices = @transform_1, window_bounds = array<i64: 16, 128, 128>}, {pipeline_mode = #tpu.pipeline_mode<synchronous>, transform_indices = @transform_2, window_bounds = array<i64: 1, 128>}, {pipeline_mode = #tpu.pipeline_mode<synchronous>, transform_indices = @transform_3, window_bounds = array<i64: 128, 8>}, {pipeline_mode = #tpu.pipeline_mode<synchronous>, transform_indices = @transform_4, window_bounds = array<i64: 1, 8>}, {transform_indices = @transform_5, window_bounds = array<i64: 4, 8>}]} {
    %c0 = arith.constant 0 : index
    %c0_0 = arith.constant 0 : index
    %0 = vector.load %arg1[%c0, %c0_0] : memref<4x16xi32, #tpu.memory_space<vmem>>, vector<4x16xi32>
    %1 = tpu.iota {dimensions = array<i32: 1>} : vector<4x128xi32>
    %cst = arith.constant 0.000000e+00 : f32
    %2 = vector.broadcast %cst : f32 to vector<4x128xf32>
    %3 = vector.extract_strided_slice %0 {offsets = [0, 0], sizes = [4, 1], strides = [1, 1]} : vector<4x16xi32> to vector<4x1xi32>
    %4 = vector.broadcast %3 : vector<4x1xi32> to vector<4x128xi32>
    %5 = arith.cmpi eq, %4, %1 : vector<4x128xi32>
    %6 = arith.extui %5 : vector<4x128xi1> to vector<4x128xi32>
    %7 = arith.sitofp %6 : vector<4x128xi32> to vector<4x128xf32>
    %c0_1 = arith.constant 0 : index
    %c0_2 = arith.constant 0 : index
    %c0_3 = arith.constant 0 : index
    %8 = vector.load %arg2[%c0_1, %c0_2, %c0_3] : memref<16x128x128xf32, #tpu.memory_space<vmem>>, vector<1x128x128xf32>
    %9 = vector.shape_cast %8 : vector<1x128x128xf32> to vector<128x128xf32>
    %cst_4 = arith.constant dense<0.000000e+00> : vector<4x128xf32>
    %10 = tpu.matmul %7, %9, %cst_4 {dimension_numbers = #tpu.dot_dimension_numbers<[1], [0], [0], [1], [0, 0, 1, 1], [], []>} : vector<4x128xf32>, vector<128x128xf32>, vector<4x128xf32> -> vector<4x128xf32>
    %11 = arith.addf %2, %10 : vector<4x128xf32>
    %12 = vector.extract_strided_slice %0 {offsets = [0, 1], sizes = [4, 1], strides = [1, 1]} : vector<4x16xi32> to vector<4x1xi32>
    %13 = vector.broadcast %12 : vector<4x1xi32> to vector<4x128xi32>
    %14 = arith.cmpi eq, %13, %1 : vector<4x128xi32>
    %15 = arith.extui %14 : vector<4x128xi1> to vector<4x128xi32>
    %16 = arith.sitofp %15 : vector<4x128xi32> to vector<4x128xf32>
    %c1 = arith.constant 1 : index
    %c0_5 = arith.constant 0 : index
    %c0_6 = arith.constant 0 : index
    %17 = vector.load %arg2[%c1, %c0_5, %c0_6] : memref<16x128x128xf32, #tpu.memory_space<vmem>>, vector<1x128x128xf32>
    %18 = vector.shape_cast %17 : vector<1x128x128xf32> to vector<128x128xf32>
    %cst_7 = arith.constant dense<0.000000e+00> : vector<4x128xf32>
    %19 = tpu.matmul %16, %18, %cst_7 {dimension_numbers = #tpu.dot_dimension_numbers<[1], [0], [0], [1], [0, 0, 1, 1], [], []>} : vector<4x128xf32>, vector<128x128xf32>, vector<4x128xf32> -> vector<4x128xf32>
    %20 = arith.addf %11, %19 : vector<4x128xf32>
    %21 = vector.extract_strided_slice %0 {offsets = [0, 2], sizes = [4, 1], strides = [1, 1]} : vector<4x16xi32> to vector<4x1xi32>
    %22 = vector.broadcast %21 : vector<4x1xi32> to vector<4x128xi32>
    %23 = arith.cmpi eq, %22, %1 : vector<4x128xi32>
    %24 = arith.extui %23 : vector<4x128xi1> to vector<4x128xi32>
    %25 = arith.sitofp %24 : vector<4x128xi32> to vector<4x128xf32>
    %c2 = arith.constant 2 : index
    %c0_8 = arith.constant 0 : index
    %c0_9 = arith.constant 0 : index
    %26 = vector.load %arg2[%c2, %c0_8, %c0_9] : memref<16x128x128xf32, #tpu.memory_space<vmem>>, vector<1x128x128xf32>
    %27 = vector.shape_cast %26 : vector<1x128x128xf32> to vector<128x128xf32>
    %cst_10 = arith.constant dense<0.000000e+00> : vector<4x128xf32>
    %28 = tpu.matmul %25, %27, %cst_10 {dimension_numbers = #tpu.dot_dimension_numbers<[1], [0], [0], [1], [0, 0, 1, 1], [], []>} : vector<4x128xf32>, vector<128x128xf32>, vector<4x128xf32> -> vector<4x128xf32>
    %29 = arith.addf %20, %28 : vector<4x128xf32>
    %30 = vector.extract_strided_slice %0 {offsets = [0, 3], sizes = [4, 1], strides = [1, 1]} : vector<4x16xi32> to vector<4x1xi32>
    %31 = vector.broadcast %30 : vector<4x1xi32> to vector<4x128xi32>
    %32 = arith.cmpi eq, %31, %1 : vector<4x128xi32>
    %33 = arith.extui %32 : vector<4x128xi1> to vector<4x128xi32>
    %34 = arith.sitofp %33 : vector<4x128xi32> to vector<4x128xf32>
    %c3 = arith.constant 3 : index
    %c0_11 = arith.constant 0 : index
    %c0_12 = arith.constant 0 : index
    %35 = vector.load %arg2[%c3, %c0_11, %c0_12] : memref<16x128x128xf32, #tpu.memory_space<vmem>>, vector<1x128x128xf32>
    %36 = vector.shape_cast %35 : vector<1x128x128xf32> to vector<128x128xf32>
    %cst_13 = arith.constant dense<0.000000e+00> : vector<4x128xf32>
    %37 = tpu.matmul %34, %36, %cst_13 {dimension_numbers = #tpu.dot_dimension_numbers<[1], [0], [0], [1], [0, 0, 1, 1], [], []>} : vector<4x128xf32>, vector<128x128xf32>, vector<4x128xf32> -> vector<4x128xf32>
    %38 = arith.addf %29, %37 : vector<4x128xf32>
    %39 = vector.extract_strided_slice %0 {offsets = [0, 4], sizes = [4, 1], strides = [1, 1]} : vector<4x16xi32> to vector<4x1xi32>
    %40 = vector.broadcast %39 : vector<4x1xi32> to vector<4x128xi32>
    %41 = arith.cmpi eq, %40, %1 : vector<4x128xi32>
    %42 = arith.extui %41 : vector<4x128xi1> to vector<4x128xi32>
    %43 = arith.sitofp %42 : vector<4x128xi32> to vector<4x128xf32>
    %c4 = arith.constant 4 : index
    %c0_14 = arith.constant 0 : index
    %c0_15 = arith.constant 0 : index
    %44 = vector.load %arg2[%c4, %c0_14, %c0_15] : memref<16x128x128xf32, #tpu.memory_space<vmem>>, vector<1x128x128xf32>
    %45 = vector.shape_cast %44 : vector<1x128x128xf32> to vector<128x128xf32>
    %cst_16 = arith.constant dense<0.000000e+00> : vector<4x128xf32>
    %46 = tpu.matmul %43, %45, %cst_16 {dimension_numbers = #tpu.dot_dimension_numbers<[1], [0], [0], [1], [0, 0, 1, 1], [], []>} : vector<4x128xf32>, vector<128x128xf32>, vector<4x128xf32> -> vector<4x128xf32>
    %47 = arith.addf %38, %46 : vector<4x128xf32>
    %48 = vector.extract_strided_slice %0 {offsets = [0, 5], sizes = [4, 1], strides = [1, 1]} : vector<4x16xi32> to vector<4x1xi32>
    %49 = vector.broadcast %48 : vector<4x1xi32> to vector<4x128xi32>
    %50 = arith.cmpi eq, %49, %1 : vector<4x128xi32>
    %51 = arith.extui %50 : vector<4x128xi1> to vector<4x128xi32>
    %52 = arith.sitofp %51 : vector<4x128xi32> to vector<4x128xf32>
    %c5 = arith.constant 5 : index
    %c0_17 = arith.constant 0 : index
    %c0_18 = arith.constant 0 : index
    %53 = vector.load %arg2[%c5, %c0_17, %c0_18] : memref<16x128x128xf32, #tpu.memory_space<vmem>>, vector<1x128x128xf32>
    %54 = vector.shape_cast %53 : vector<1x128x128xf32> to vector<128x128xf32>
    %cst_19 = arith.constant dense<0.000000e+00> : vector<4x128xf32>
    %55 = tpu.matmul %52, %54, %cst_19 {dimension_numbers = #tpu.dot_dimension_numbers<[1], [0], [0], [1], [0, 0, 1, 1], [], []>} : vector<4x128xf32>, vector<128x128xf32>, vector<4x128xf32> -> vector<4x128xf32>
    %56 = arith.addf %47, %55 : vector<4x128xf32>
    %57 = vector.extract_strided_slice %0 {offsets = [0, 6], sizes = [4, 1], strides = [1, 1]} : vector<4x16xi32> to vector<4x1xi32>
    %58 = vector.broadcast %57 : vector<4x1xi32> to vector<4x128xi32>
    %59 = arith.cmpi eq, %58, %1 : vector<4x128xi32>
    %60 = arith.extui %59 : vector<4x128xi1> to vector<4x128xi32>
    %61 = arith.sitofp %60 : vector<4x128xi32> to vector<4x128xf32>
    %c6 = arith.constant 6 : index
    %c0_20 = arith.constant 0 : index
    %c0_21 = arith.constant 0 : index
    %62 = vector.load %arg2[%c6, %c0_20, %c0_21] : memref<16x128x128xf32, #tpu.memory_space<vmem>>, vector<1x128x128xf32>
    %63 = vector.shape_cast %62 : vector<1x128x128xf32> to vector<128x128xf32>
    %cst_22 = arith.constant dense<0.000000e+00> : vector<4x128xf32>
    %64 = tpu.matmul %61, %63, %cst_22 {dimension_numbers = #tpu.dot_dimension_numbers<[1], [0], [0], [1], [0, 0, 1, 1], [], []>} : vector<4x128xf32>, vector<128x128xf32>, vector<4x128xf32> -> vector<4x128xf32>
    %65 = arith.addf %56, %64 : vector<4x128xf32>
    %66 = vector.extract_strided_slice %0 {offsets = [0, 7], sizes = [4, 1], strides = [1, 1]} : vector<4x16xi32> to vector<4x1xi32>
    %67 = vector.broadcast %66 : vector<4x1xi32> to vector<4x128xi32>
    %68 = arith.cmpi eq, %67, %1 : vector<4x128xi32>
    %69 = arith.extui %68 : vector<4x128xi1> to vector<4x128xi32>
    %70 = arith.sitofp %69 : vector<4x128xi32> to vector<4x128xf32>
    %c7 = arith.constant 7 : index
    %c0_23 = arith.constant 0 : index
    %c0_24 = arith.constant 0 : index
    %71 = vector.load %arg2[%c7, %c0_23, %c0_24] : memref<16x128x128xf32, #tpu.memory_space<vmem>>, vector<1x128x128xf32>
    %72 = vector.shape_cast %71 : vector<1x128x128xf32> to vector<128x128xf32>
    %cst_25 = arith.constant dense<0.000000e+00> : vector<4x128xf32>
    %73 = tpu.matmul %70, %72, %cst_25 {dimension_numbers = #tpu.dot_dimension_numbers<[1], [0], [0], [1], [0, 0, 1, 1], [], []>} : vector<4x128xf32>, vector<128x128xf32>, vector<4x128xf32> -> vector<4x128xf32>
    %74 = arith.addf %65, %73 : vector<4x128xf32>
    %75 = vector.extract_strided_slice %0 {offsets = [0, 8], sizes = [4, 1], strides = [1, 1]} : vector<4x16xi32> to vector<4x1xi32>
    %76 = vector.broadcast %75 : vector<4x1xi32> to vector<4x128xi32>
    %77 = arith.cmpi eq, %76, %1 : vector<4x128xi32>
    %78 = arith.extui %77 : vector<4x128xi1> to vector<4x128xi32>
    %79 = arith.sitofp %78 : vector<4x128xi32> to vector<4x128xf32>
    %c8 = arith.constant 8 : index
    %c0_26 = arith.constant 0 : index
    %c0_27 = arith.constant 0 : index
    %80 = vector.load %arg2[%c8, %c0_26, %c0_27] : memref<16x128x128xf32, #tpu.memory_space<vmem>>, vector<1x128x128xf32>
    %81 = vector.shape_cast %80 : vector<1x128x128xf32> to vector<128x128xf32>
    %cst_28 = arith.constant dense<0.000000e+00> : vector<4x128xf32>
    %82 = tpu.matmul %79, %81, %cst_28 {dimension_numbers = #tpu.dot_dimension_numbers<[1], [0], [0], [1], [0, 0, 1, 1], [], []>} : vector<4x128xf32>, vector<128x128xf32>, vector<4x128xf32> -> vector<4x128xf32>
    %83 = arith.addf %74, %82 : vector<4x128xf32>
    %84 = vector.extract_strided_slice %0 {offsets = [0, 9], sizes = [4, 1], strides = [1, 1]} : vector<4x16xi32> to vector<4x1xi32>
    %85 = vector.broadcast %84 : vector<4x1xi32> to vector<4x128xi32>
    %86 = arith.cmpi eq, %85, %1 : vector<4x128xi32>
    %87 = arith.extui %86 : vector<4x128xi1> to vector<4x128xi32>
    %88 = arith.sitofp %87 : vector<4x128xi32> to vector<4x128xf32>
    %c9 = arith.constant 9 : index
    %c0_29 = arith.constant 0 : index
    %c0_30 = arith.constant 0 : index
    %89 = vector.load %arg2[%c9, %c0_29, %c0_30] : memref<16x128x128xf32, #tpu.memory_space<vmem>>, vector<1x128x128xf32>
    %90 = vector.shape_cast %89 : vector<1x128x128xf32> to vector<128x128xf32>
    %cst_31 = arith.constant dense<0.000000e+00> : vector<4x128xf32>
    %91 = tpu.matmul %88, %90, %cst_31 {dimension_numbers = #tpu.dot_dimension_numbers<[1], [0], [0], [1], [0, 0, 1, 1], [], []>} : vector<4x128xf32>, vector<128x128xf32>, vector<4x128xf32> -> vector<4x128xf32>
    %92 = arith.addf %83, %91 : vector<4x128xf32>
    %93 = vector.extract_strided_slice %0 {offsets = [0, 10], sizes = [4, 1], strides = [1, 1]} : vector<4x16xi32> to vector<4x1xi32>
    %94 = vector.broadcast %93 : vector<4x1xi32> to vector<4x128xi32>
    %95 = arith.cmpi eq, %94, %1 : vector<4x128xi32>
    %96 = arith.extui %95 : vector<4x128xi1> to vector<4x128xi32>
    %97 = arith.sitofp %96 : vector<4x128xi32> to vector<4x128xf32>
    %c10 = arith.constant 10 : index
    %c0_32 = arith.constant 0 : index
    %c0_33 = arith.constant 0 : index
    %98 = vector.load %arg2[%c10, %c0_32, %c0_33] : memref<16x128x128xf32, #tpu.memory_space<vmem>>, vector<1x128x128xf32>
    %99 = vector.shape_cast %98 : vector<1x128x128xf32> to vector<128x128xf32>
    %cst_34 = arith.constant dense<0.000000e+00> : vector<4x128xf32>
    %100 = tpu.matmul %97, %99, %cst_34 {dimension_numbers = #tpu.dot_dimension_numbers<[1], [0], [0], [1], [0, 0, 1, 1], [], []>} : vector<4x128xf32>, vector<128x128xf32>, vector<4x128xf32> -> vector<4x128xf32>
    %101 = arith.addf %92, %100 : vector<4x128xf32>
    %102 = vector.extract_strided_slice %0 {offsets = [0, 11], sizes = [4, 1], strides = [1, 1]} : vector<4x16xi32> to vector<4x1xi32>
    %103 = vector.broadcast %102 : vector<4x1xi32> to vector<4x128xi32>
    %104 = arith.cmpi eq, %103, %1 : vector<4x128xi32>
    %105 = arith.extui %104 : vector<4x128xi1> to vector<4x128xi32>
    %106 = arith.sitofp %105 : vector<4x128xi32> to vector<4x128xf32>
    %c11 = arith.constant 11 : index
    %c0_35 = arith.constant 0 : index
    %c0_36 = arith.constant 0 : index
    %107 = vector.load %arg2[%c11, %c0_35, %c0_36] : memref<16x128x128xf32, #tpu.memory_space<vmem>>, vector<1x128x128xf32>
    %108 = vector.shape_cast %107 : vector<1x128x128xf32> to vector<128x128xf32>
    %cst_37 = arith.constant dense<0.000000e+00> : vector<4x128xf32>
    %109 = tpu.matmul %106, %108, %cst_37 {dimension_numbers = #tpu.dot_dimension_numbers<[1], [0], [0], [1], [0, 0, 1, 1], [], []>} : vector<4x128xf32>, vector<128x128xf32>, vector<4x128xf32> -> vector<4x128xf32>
    %110 = arith.addf %101, %109 : vector<4x128xf32>
    %111 = vector.extract_strided_slice %0 {offsets = [0, 12], sizes = [4, 1], strides = [1, 1]} : vector<4x16xi32> to vector<4x1xi32>
    %112 = vector.broadcast %111 : vector<4x1xi32> to vector<4x128xi32>
    %113 = arith.cmpi eq, %112, %1 : vector<4x128xi32>
    %114 = arith.extui %113 : vector<4x128xi1> to vector<4x128xi32>
    %115 = arith.sitofp %114 : vector<4x128xi32> to vector<4x128xf32>
    %c12 = arith.constant 12 : index
    %c0_38 = arith.constant 0 : index
    %c0_39 = arith.constant 0 : index
    %116 = vector.load %arg2[%c12, %c0_38, %c0_39] : memref<16x128x128xf32, #tpu.memory_space<vmem>>, vector<1x128x128xf32>
    %117 = vector.shape_cast %116 : vector<1x128x128xf32> to vector<128x128xf32>
    %cst_40 = arith.constant dense<0.000000e+00> : vector<4x128xf32>
    %118 = tpu.matmul %115, %117, %cst_40 {dimension_numbers = #tpu.dot_dimension_numbers<[1], [0], [0], [1], [0, 0, 1, 1], [], []>} : vector<4x128xf32>, vector<128x128xf32>, vector<4x128xf32> -> vector<4x128xf32>
    %119 = arith.addf %110, %118 : vector<4x128xf32>
    %120 = vector.extract_strided_slice %0 {offsets = [0, 13], sizes = [4, 1], strides = [1, 1]} : vector<4x16xi32> to vector<4x1xi32>
    %121 = vector.broadcast %120 : vector<4x1xi32> to vector<4x128xi32>
    %122 = arith.cmpi eq, %121, %1 : vector<4x128xi32>
    %123 = arith.extui %122 : vector<4x128xi1> to vector<4x128xi32>
    %124 = arith.sitofp %123 : vector<4x128xi32> to vector<4x128xf32>
    %c13 = arith.constant 13 : index
    %c0_41 = arith.constant 0 : index
    %c0_42 = arith.constant 0 : index
    %125 = vector.load %arg2[%c13, %c0_41, %c0_42] : memref<16x128x128xf32, #tpu.memory_space<vmem>>, vector<1x128x128xf32>
    %126 = vector.shape_cast %125 : vector<1x128x128xf32> to vector<128x128xf32>
    %cst_43 = arith.constant dense<0.000000e+00> : vector<4x128xf32>
    %127 = tpu.matmul %124, %126, %cst_43 {dimension_numbers = #tpu.dot_dimension_numbers<[1], [0], [0], [1], [0, 0, 1, 1], [], []>} : vector<4x128xf32>, vector<128x128xf32>, vector<4x128xf32> -> vector<4x128xf32>
    %128 = arith.addf %119, %127 : vector<4x128xf32>
    %129 = vector.extract_strided_slice %0 {offsets = [0, 14], sizes = [4, 1], strides = [1, 1]} : vector<4x16xi32> to vector<4x1xi32>
    %130 = vector.broadcast %129 : vector<4x1xi32> to vector<4x128xi32>
    %131 = arith.cmpi eq, %130, %1 : vector<4x128xi32>
    %132 = arith.extui %131 : vector<4x128xi1> to vector<4x128xi32>
    %133 = arith.sitofp %132 : vector<4x128xi32> to vector<4x128xf32>
    %c14 = arith.constant 14 : index
    %c0_44 = arith.constant 0 : index
    %c0_45 = arith.constant 0 : index
    %134 = vector.load %arg2[%c14, %c0_44, %c0_45] : memref<16x128x128xf32, #tpu.memory_space<vmem>>, vector<1x128x128xf32>
    %135 = vector.shape_cast %134 : vector<1x128x128xf32> to vector<128x128xf32>
    %cst_46 = arith.constant dense<0.000000e+00> : vector<4x128xf32>
    %136 = tpu.matmul %133, %135, %cst_46 {dimension_numbers = #tpu.dot_dimension_numbers<[1], [0], [0], [1], [0, 0, 1, 1], [], []>} : vector<4x128xf32>, vector<128x128xf32>, vector<4x128xf32> -> vector<4x128xf32>
    %137 = arith.addf %128, %136 : vector<4x128xf32>
    %138 = vector.extract_strided_slice %0 {offsets = [0, 15], sizes = [4, 1], strides = [1, 1]} : vector<4x16xi32> to vector<4x1xi32>
    %139 = vector.broadcast %138 : vector<4x1xi32> to vector<4x128xi32>
    %140 = arith.cmpi eq, %139, %1 : vector<4x128xi32>
    %141 = arith.extui %140 : vector<4x128xi1> to vector<4x128xi32>
    %142 = arith.sitofp %141 : vector<4x128xi32> to vector<4x128xf32>
    %c15 = arith.constant 15 : index
    %c0_47 = arith.constant 0 : index
    %c0_48 = arith.constant 0 : index
    %143 = vector.load %arg2[%c15, %c0_47, %c0_48] : memref<16x128x128xf32, #tpu.memory_space<vmem>>, vector<1x128x128xf32>
    %144 = vector.shape_cast %143 : vector<1x128x128xf32> to vector<128x128xf32>
    %cst_49 = arith.constant dense<0.000000e+00> : vector<4x128xf32>
    %145 = tpu.matmul %142, %144, %cst_49 {dimension_numbers = #tpu.dot_dimension_numbers<[1], [0], [0], [1], [0, 0, 1, 1], [], []>} : vector<4x128xf32>, vector<128x128xf32>, vector<4x128xf32> -> vector<4x128xf32>
    %146 = arith.addf %137, %145 : vector<4x128xf32>
    %c0_50 = arith.constant 0 : index
    %c0_51 = arith.constant 0 : index
    %147 = vector.load %arg3[%c0_50, %c0_51] : memref<1x128xf32, #tpu.memory_space<vmem>>, vector<1x128xf32>
    %148 = vector.broadcast %147 : vector<1x128xf32> to vector<4x128xf32>
    %149 = arith.addf %146, %148 : vector<4x128xf32>
    %cst_52 = arith.constant 0.000000e+00 : f32
    %150 = vector.broadcast %cst_52 : f32 to vector<4x128xf32>
    %151 = arith.maximumf %149, %150 : vector<4x128xf32>
    %c0_53 = arith.constant 0 : index
    %c0_54 = arith.constant 0 : index
    %152 = vector.load %arg4[%c0_53, %c0_54] : memref<128x8xf32, #tpu.memory_space<vmem>>, vector<128x8xf32>
    %cst_55 = arith.constant dense<0.000000e+00> : vector<4x8xf32>
    %153 = tpu.matmul %151, %152, %cst_55 {dimension_numbers = #tpu.dot_dimension_numbers<[1], [0], [0], [1], [0, 0, 1, 1], [], []>} : vector<4x128xf32>, vector<128x8xf32>, vector<4x8xf32> -> vector<4x8xf32>
    %c0_56 = arith.constant 0 : index
    %c0_57 = arith.constant 0 : index
    %154 = vector.load %arg5[%c0_56, %c0_57] : memref<1x8xf32, #tpu.memory_space<vmem>>, vector<1x8xf32>
    %155 = vector.broadcast %154 : vector<1x8xf32> to vector<4x8xf32>
    %156 = arith.addf %153, %155 : vector<4x8xf32>
    %c0_58 = arith.constant 0 : index
    %c0_59 = arith.constant 0 : index
    %157 = vector.load %arg6[%c0_58, %c0_59] : memref<4x8xf32, #tpu.memory_space<vmem>>, vector<4x8xf32>
    tpu.vector_store %arg6[%c0_58, %c0_59], %156 {strides = array<i32>} : memref<4x8xf32, #tpu.memory_space<vmem>>, vector<4x8xf32>,
    return
  }
  func.func @transform_0(%arg0: i32) -> (i32, i32) {
    %c0_i32 = arith.constant 0 : i32
    %c0_i32_0 = arith.constant 0 : i32
    return %arg0, %c0_i32 : i32, i32
  }
  func.func @transform_1(%arg0: i32) -> (i32, i32, i32) {
    %c0_i32 = arith.constant 0 : i32
    %c0_i32_0 = arith.constant 0 : i32
    %c0_i32_1 = arith.constant 0 : i32
    %c0_i32_2 = arith.constant 0 : i32
    return %c0_i32, %c0_i32_0, %c0_i32_1 : i32, i32, i32
  }
  func.func @transform_2(%arg0: i32) -> (i32, i32) {
    %c0_i32 = arith.constant 0 : i32
    %c0_i32_0 = arith.constant 0 : i32
    %c0_i32_1 = arith.constant 0 : i32
    return %c0_i32, %c0_i32_0 : i32, i32
  }
  func.func @transform_3(%arg0: i32) -> (i32, i32) {
    %c0_i32 = arith.constant 0 : i32
    %c0_i32_0 = arith.constant 0 : i32
    %c0_i32_1 = arith.constant 0 : i32
    return %c0_i32, %c0_i32_0 : i32, i32
  }
  func.func @transform_4(%arg0: i32) -> (i32, i32) {
    %c0_i32 = arith.constant 0 : i32
    %c0_i32_0 = arith.constant 0 : i32
    %c0_i32_1 = arith.constant 0 : i32
    return %c0_i32, %c0_i32_0 : i32, i32
  }
  func.func @transform_5(%arg0: i32) -> (i32, i32) {
    %c0_i32 = arith.constant 0 : i32
    %c0_i32_0 = arith.constant 0 : i32
    return %arg0, %c0_i32 : i32, i32
  }
}

</mosaic_0001>

<bundles_post_ra>
// kernel: tpu_custom_call.1
= control target key start
LH: loop header
LB: loop body
LE: loop exit
PB: predicated region body
PF: predicated region fallthrough
CT: control target
= control target key end

     0   :  { %10 = vsyncpa [#allocation3], 0  ;;  %s1098_s0 = inlined_call_operand.vmem [shape: s32[4,16], index: 0, kind: input, shape index: {}]   ;;  %s1099_s1 = inlined_call_operand.hbm [shape: f32[16,128,128], index: 1, kind: input, shape index: {}]   ;;  %s1100_s2 = inlined_call_operand.vmem [shape: f32[1,128], index: 2, kind: input, shape index: {}]   ;;  %s1101_s3 = inlined_call_operand.vmem [shape: f32[128,8], index: 3, kind: input, shape index: {}]   ;;  %s1102_s4 = inlined_call_operand.vmem [shape: f32[1,8], index: 4, kind: input, shape index: {}]   ;;  %s1103_s5 = inlined_call_operand.hbm [shape: f32[4,8], index: 5, kind: output, shape index: {}]  }
   0x1   :  { %11 = vsyncpa [#allocation4], 0  ;;  %s18_s20 = sshll.u32 %s1099_s1, 4  ;;  %s930_s21 = smov [#allocation2]   ;;  %s19_s20 = int_to_ptr.hbm [resolvable:$true] %s18_s20 }
   0x2   :  { %s20_s22 = sshll.u32 %s930_s21, 4  ;;  %s931_s23 = smov 128   ;;  %s21_s22 = int_to_ptr.vmem [resolvable:$true] %s20_s22 }
   0x3   :  { %s932_s24 = smov 8  }
   0x4   :  { %26 = dma.hbm_to_vmem [thread:$0]  %s19_s20, 32768, %s21_s22, [#allocation3], %s931_s23, %s931_s23, %s932_s24  }
   0x5   :  { %926 = dma.done.wait [#allocation3], 32768  }
   0x6   :  { %927 = vsyncadd [#allocation3], 4294934528  ;;  %v933_v0 = vmov 3   ;;  %v934_v1 = vmov 2   ;;  %v935_v2 = vmov 6   ;;  %v147_v4 = vld [vmem:[#allocation2 + $0x178] sm:$0xff] }
   0x7   :  { %861 = vset.pattern.permute.xlu1 %v933_v0  ;;  %859 = vset.pattern.permute.xlu0 %v934_v1  ;;  %v987_v3 = vld [vmem:[%s1098_s0] sm:$0xf]  ;;  %v146_v5 = vld [vmem:[#allocation2 + $0x170] sm:$0xff]  ;;  %v84_v6 = vld [vmem:[#allocation2 + $0xf8] sm:$0xff]  ;;  %v936_v10 = vmov 0   ;;  %v937_v11 = vmov 1  }
   0x8   :  { %863 = vset.pattern.permute.xlu2 %v935_v2  ;;  %170 = vperm.xlu1 %861, %v987_v3   ;;  %v191_v7 = vld [vmem:[#allocation2 + $0x1f8] sm:$0xff]  ;;  %v145_v9 = vld [vmem:[#allocation2 + $0x168] sm:$0xff]  ;;  %v83_v12 = vld [vmem:[#allocation2 + $0xf0] sm:$0xff]  ;;  %v938_v15 = vmov 4   ;;  %v939_v25 = vmov 7   ;;  %v940_v26 = vmov 10  }
   0x9   :  { %126 = vperm.xlu0 %859, %v987_v3   ;;  %302 = vperm.xlu2 %863, %v987_v3   ;;  %v61_v8 = vld [vmem:[#allocation2 + $0x78] sm:$0xff]  ;;  %v144_v13 = vld [vmem:[#allocation2 + $0x160] sm:$0xff]  ;;  %v190_v14 = vld [vmem:[#allocation2 + $0x1f0] sm:$0xff]  ;;  %v941_v30 = vmov 5   ;;  %v942_v40 = vmov 8   ;;  %v943_v41 = vmov 12  }
   0xa   :  { %148 = vmatpush.msra.mxu2 %v147_v4  ;;  %85 = vmatpush.msra.mxu0 %v84_v6  ;;  %v82_v16 = vld [vmem:[#allocation2 + $0xe8] sm:$0xff]  ;;  %v60_v17 = vld [vmem:[#allocation2 + $0x70] sm:$0xff]  ;;  %v143_v18 = vld [vmem:[#allocation2 + $0x158] sm:$0xff]  ;;  %v944_v45 = vmov 11   ;;  %v945_v58 = vmov 9   ;;  %s950_s8 = smov [#allocation5]  }
   0xb   :  { %192 = vmatpush.msra.mxu3 %v191_v7  ;;  %105 = vmatpush.msra.mxu1 %v61_v8  ;;  %v189_v19 = vld [vmem:[#allocation2 + $0x1e8] sm:$0xff]  ;;  %v81_v20 = vld [vmem:[#allocation2 + $0xe0] sm:$0xff]  ;;  %v142_v22 = vld [vmem:[#allocation2 + $0x150] sm:$0xff]  ;;  %v946_v8 = vmov 14   ;;  %s794_s9 = sshll.u32 %s950_s8, 4  ;;  %s796_s12 = sshll.u32 %s1103_s5, 4  ;;  %s795_s9 = int_to_ptr.vmem [resolvable:$true] %s794_s9  ;;  %s797_s12 = int_to_ptr.hbm [resolvable:$true] %s796_s12 }
   0xc   :  { %149 = vmatpush.msra.mxu2 %v146_v5  ;;  %86 = vmatpush.msra.mxu0 %v83_v12  ;;  %v59_v21 = vld [vmem:[#allocation2 + $0x68] sm:$0xff]  ;;  %v188_v23 = vld [vmem:[#allocation2 + $0x1e0] sm:$0xff]  ;;  %v80_v27 = vld [vmem:[#allocation2 + $0xd8] sm:$0xff] }
   0xd   :  { %193 = vmatpush.msra.mxu3 %v190_v14  ;;  %106 = vmatpush.msra.mxu1 %v60_v17  ;;  %v141_v24 = vld [vmem:[#allocation2 + $0x148] sm:$0xff]  ;;  %v140_v28 = vld [vmem:[#allocation2 + $0x140] sm:$0xff]  ;;  %v187_v31 = vld [vmem:[#allocation2 + $0x1d8] sm:$0xff] }
   0xe   :  { %150 = vmatpush.msra.mxu2 %v145_v9  ;;  %87 = vmatpush.msra.mxu0 %v82_v16  ;;  %v58_v29 = vld [vmem:[#allocation2 + $0x60] sm:$0xff]  ;;  %v79_v32 = vld [vmem:[#allocation2 + $0xd0] sm:$0xff]  ;;  %v139_v33 = vld [vmem:[#allocation2 + $0x138] sm:$0xff] }
   0xf   :  { %194 = vmatpush.msra.mxu3 %v189_v19  ;;  %107 = vmatpush.msra.mxu1 %v59_v21  ;;  %v57_v34 = vld [vmem:[#allocation2 + $0x58] sm:$0xff]  ;;  %v186_v35 = vld [vmem:[#allocation2 + $0x1d0] sm:$0xff]  ;;  %v78_v36 = vld [vmem:[#allocation2 + $0xc8] sm:$0xff] }
  0x10   :  { %862 = vset.pattern.permute.xlu1 %v936_v10  ;;  %151 = vmatpush.msra.mxu2 %v144_v13  ;;  %v138_v37 = vld [vmem:[#allocation2 + $0x130] sm:$0xff]  ;;  %v185_v39 = vld [vmem:[#allocation2 + $0x1c8] sm:$0xff]  ;;  %v77_v43 = vld [vmem:[#allocation2 + $0xc0] sm:$0xff] }
  0x11   :  { %860 = vset.pattern.permute.xlu0 %v937_v11  ;;  %41 = vperm.xlu1 %862, %v987_v3   ;;  %v56_v38 = vld [vmem:[#allocation2 + $0x50] sm:$0xff]  ;;  %v137_v42 = vld [vmem:[#allocation2 + $0x128] sm:$0xff]  ;;  %v184_v46 = vld [vmem:[#allocation2 + $0x1c0] sm:$0xff]  ;;  %v947_v11 = vmov 15  }
  0x12   :  { %63 = vperm.xlu0 %860, %v987_v3   ;;  %864 = vset.pattern.permute.xlu2 %v938_v15  ;;  %v55_v44 = vld [vmem:[#allocation2 + $0x48] sm:$0xff]  ;;  %v136_v47 = vld [vmem:[#allocation2 + $0x120] sm:$0xff]  ;;  %v76_v48 = vld [vmem:[#allocation2 + $0xb8] sm:$0xff] }
  0x13   :  { %214 = vperm.xlu2 %864, %v987_v3   ;;  %152 = vmatpush.msra.mxu2 %v143_v18  ;;  %v54_v49 = vld [vmem:[#allocation2 + $0x40] sm:$0xff]  ;;  %v183_v50 = vld [vmem:[#allocation2 + $0x1b8] sm:$0xff]  ;;  %v75_v52 = vld [vmem:[#allocation2 + $0xb0] sm:$0xff] }
  0x14   :  { %88 = vmatpush.msra.mxu0 %v81_v20  ;;  %195 = vmatpush.msra.mxu3 %v188_v23  ;;  %v135_v51 = vld [vmem:[#allocation2 + $0x118] sm:$0xff]  ;;  %v182_v54 = vld [vmem:[#allocation2 + $0x1b0] sm:$0xff]  ;;  %v74_v56 = vld [vmem:[#allocation2 + $0xa8] sm:$0xff] }
  0x15   :  { %153 = vmatpush.msra.mxu2 %v142_v22  ;;  %108 = vmatpush.msra.mxu1 %v58_v29  ;;  %v53_v53 = vld [vmem:[#allocation2 + $0x38] sm:$0xff]  ;;  %v134_v55 = vld [vmem:[#allocation2 + $0x110] sm:$0xff]  ;;  %v181_v59 = vld [vmem:[#allocation2 + $0x1a8] sm:$0xff] }
  0x16   :  { %89 = vmatpush.msra.mxu0 %v80_v27  ;;  %196 = vmatpush.msra.mxu3 %v187_v31  ;;  %v52_v57 = vld [vmem:[#allocation2 + $0x30] sm:$0xff]  ;;  %v133_v60 = vld [vmem:[#allocation2 + $0x108] sm:$0xff]  ;;  %v73_v61 = vld [vmem:[#allocation2 + $0xa0] sm:$0xff] }
  0x17   :  { %154 = vmatpush.msra.mxu2 %v141_v24  ;;  %109 = vmatpush.msra.mxu1 %v57_v34  ;;  %v51_v62 = vld [vmem:[#allocation2 + $0x28] sm:$0xff]  ;;  %v180_v63 = vld [vmem:[#allocation2 + $0x1a0] sm:$0xff]  ;;  %v72_v1 = vld [vmem:[#allocation2 + $0x98] sm:$0xff] }
  0x18   :  { %90 = vmatpush.msra.mxu0 %v79_v32  ;;  %197 = vmatpush.msra.mxu3 %v186_v35  ;;  %v132_v0 = vld [vmem:[#allocation2 + $0x100] sm:$0xff]  ;;  %v179_v4 = vld [vmem:[#allocation2 + $0x198] sm:$0xff]  ;;  %v71_v6 = vld [vmem:[#allocation2 + $0x90] sm:$0xff] }
  0x19   :  { %865 = vset.pattern.permute.xlu1 %v939_v25  ;;  %155 = vmatpush.msra.mxu2 %v140_v28  ;;  %v50_v2 = vld [vmem:[#allocation2 + $0x20] sm:$0xff]  ;;  %v323_v5 = vld [vmem:[#allocation2 + $0x378] sm:$0xff]  ;;  %v178_v9 = vld [vmem:[#allocation2 + $0x190] sm:$0xff] }
  0x1a   :  { %867 = vset.pattern.permute.xlu0 %v940_v26  ;;  %346 = vperm.xlu1 %865, %v987_v3   ;;  %v49_v7 = vld [vmem:[#allocation2 + $0x18] sm:$0xff]  ;;  %v322_v10 = vld [vmem:[#allocation2 + $0x370] sm:$0xff]  ;;  %v70_v12 = vld [vmem:[#allocation2 + $0x88] sm:$0xff] }
  0x1b   :  { %478 = vperm.xlu0 %867, %v987_v3   ;;  %866 = vset.pattern.permute.xlu2 %v941_v30  ;;  %v48_v13 = vld [vmem:[#allocation2 + $0x10] sm:$0xff]  ;;  %v177_v14 = vld [vmem:[#allocation2 + $0x188] sm:$0xff]  ;;  %v69_v16 = vld [vmem:[#allocation2 + $0x80] sm:$0xff]  ;;  %v948_v30 = vmov 13  }
  0x1c   :  { %258 = vperm.xlu2 %866, %v987_v3   ;;  %156 = vmatpush.msra.mxu2 %v139_v33  ;;  %v321_v15 = vld [vmem:[#allocation2 + $0x368] sm:$0xff]  ;;  %v176_v18 = vld [vmem:[#allocation2 + $0x180] sm:$0xff]  ;;  %v235_v20 = vld [vmem:[#allocation2 + $0x278] sm:$0xff] }
  0x1d   :  { %91 = vmatpush.msra.mxu0 %v78_v36  ;;  %110 = vmatpush.msra.mxu1 %v56_v38  ;;  %v47_v17 = vld [vmem:[#allocation2 + $0x8] sm:$0xff]  ;;  %v320_v19 = vld [vmem:[#allocation2 + $0x360] sm:$0xff]  ;;  %v367_v21 = vld [vmem:[#allocation2 + $0x3f8] sm:$0xff] }
  0x1e   :  { %157 = vmatpush.msra.mxu2 %v138_v37  ;;  %198 = vmatpush.msra.mxu3 %v185_v39  ;;  %v46_v22 = vld [vmem:[#allocation2] sm:$0xff]  ;;  %v319_v23 = vld [vmem:[#allocation2 + $0x358] sm:$0xff]  ;;  %v234_v24 = vld [vmem:[#allocation2 + $0x270] sm:$0xff] }
  0x1f   :  { %92 = vmatpush.msra.mxu0 %v77_v43  ;;  %111 = vmatpush.msra.mxu1 %v55_v44  ;;  %v279_v25 = vld [vmem:[#allocation2 + $0x2f8] sm:$0xff]  ;;  %v366_v26 = vld [vmem:[#allocation2 + $0x3f0] sm:$0xff]  ;;  %v233_v28 = vld [vmem:[#allocation2 + $0x268] sm:$0xff] }
  0x20   :  { %158 = vmatpush.msra.mxu2 %v137_v42  ;;  %199 = vmatpush.msra.mxu3 %v184_v46  ;;  %v318_v27 = vld [vmem:[#allocation2 + $0x350] sm:$0xff]  ;;  %v365_v31 = vld [vmem:[#allocation2 + $0x3e8] sm:$0xff]  ;;  %v232_v33 = vld [vmem:[#allocation2 + $0x260] sm:$0xff] }
  0x21   :  { %93 = vmatpush.msra.mxu0 %v76_v48  ;;  %112 = vmatpush.msra.mxu1 %v54_v49  ;;  %v278_v29 = vld [vmem:[#allocation2 + $0x2f0] sm:$0xff]  ;;  %v317_v32 = vld [vmem:[#allocation2 + $0x348] sm:$0xff]  ;;  %v364_v35 = vld [vmem:[#allocation2 + $0x3e0] sm:$0xff] }
  0x22   :  { %868 = vset.pattern.permute.xlu1 %v942_v40  ;;  %159 = vmatpush.msra.mxu2 %v136_v47  ;;  %v277_v34 = vld [vmem:[#allocation2 + $0x2e8] sm:$0xff]  ;;  %v316_v36 = vld [vmem:[#allocation2 + $0x340] sm:$0xff]  ;;  %v231_v37 = vld [vmem:[#allocation2 + $0x258] sm:$0xff] }
  0x23   :  { %872 = vset.pattern.permute.xlu0 %v943_v41  ;;  %390 = vperm.xlu1 %868, %v987_v3   ;;  %v276_v38 = vld [vmem:[#allocation2 + $0x2e0] sm:$0xff]  ;;  %v363_v39 = vld [vmem:[#allocation2 + $0x3d8] sm:$0xff]  ;;  %v230_v41 = vld [vmem:[#allocation2 + $0x250] sm:$0xff] }
  0x24   :  { %566 = vperm.xlu0 %872, %v987_v3   ;;  %869 = vset.pattern.permute.xlu2 %v944_v45  ;;  %v315_v40 = vld [vmem:[#allocation2 + $0x338] sm:$0xff]  ;;  %v314_v43 = vld [vmem:[#allocation2 + $0x330] sm:$0xff]  ;;  %v229_v44 = vld [vmem:[#allocation2 + $0x248] sm:$0xff] }
  0x25   :  { %522 = vperm.xlu2 %869, %v987_v3   ;;  %200 = vmatpush.msra.mxu3 %v183_v50  ;;  %v275_v42 = vld [vmem:[#allocation2 + $0x2d8] sm:$0xff]  ;;  %v274_v45 = vld [vmem:[#allocation2 + $0x2d0] sm:$0xff]  ;;  %v361_v46 = vld [vmem:[#allocation2 + $0x3c8] sm:$0xff] }
  0x26   :  { %160 = vmatpush.msra.mxu2 %v135_v51  ;;  %94 = vmatpush.msra.mxu0 %v75_v52  ;;  %v313_v47 = vld [vmem:[#allocation2 + $0x328] sm:$0xff]  ;;  %v228_v48 = vld [vmem:[#allocation2 + $0x240] sm:$0xff]  ;;  %v227_v52 = vld [vmem:[#allocation2 + $0x238] sm:$0xff] }
  0x27   :  { %113 = vmatpush.msra.mxu1 %v53_v53  ;;  %201 = vmatpush.msra.mxu3 %v182_v54  ;;  %v273_v49 = vld [vmem:[#allocation2 + $0x2c8] sm:$0xff]  ;;  %v360_v50 = vld [vmem:[#allocation2 + $0x3c0] sm:$0xff]  ;;  %v359_v54 = vld [vmem:[#allocation2 + $0x3b8] sm:$0xff] }
  0x28   :  { %161 = vmatpush.msra.mxu2 %v134_v55  ;;  %95 = vmatpush.msra.mxu0 %v74_v56  ;;  %v312_v51 = vld [vmem:[#allocation2 + $0x320] sm:$0xff]  ;;  %v311_v55 = vld [vmem:[#allocation2 + $0x318] sm:$0xff]  ;;  %v226_v56 = vld [vmem:[#allocation2 + $0x230] sm:$0xff] }
  0x29   :  { %114 = vmatpush.msra.mxu1 %v52_v57  ;;  %202 = vmatpush.msra.mxu3 %v181_v59  ;;  %v272_v53 = vld [vmem:[#allocation2 + $0x2c0] sm:$0xff]  ;;  %v271_v57 = vld [vmem:[#allocation2 + $0x2b8] sm:$0xff]  ;;  %v310_v59 = vld [vmem:[#allocation2 + $0x310] sm:$0xff] }
  0x2a   :  { %162 = vmatpush.msra.mxu2 %v133_v60  ;;  %96 = vmatpush.msra.mxu0 %v73_v61  ;;  %v225_v60 = vld [vmem:[#allocation2 + $0x228] sm:$0xff]  ;;  %v270_v61 = vld [vmem:[#allocation2 + $0x2b0] sm:$0xff] }
  0x2b   :  { %870 = vset.pattern.permute.xlu1 %v945_v58  ;;  %115 = vmatpush.msra.mxu1 %v51_v62  ;;  %v358_v58 = vld [vmem:[#allocation2 + $0x3b0] sm:$0xff]  ;;  %v357_v62 = vld [vmem:[#allocation2 + $0x3a8] sm:$0xff] }
  0x2c   :  { %434 = vperm.xlu1 %870, %v987_v3   ;;  %203 = vmatpush.msra.mxu3 %v180_v63  ;;  %v309_v63 = vld [vmem:[#allocation2 + $0x308] sm:$0xff] }
  0x2d   :  { %163 = vmatpush.msra.mxu2 %v132_v0  ;;  %97 = vmatpush.msra.mxu0 %v72_v1  ;;  %v224_v0 = vld [vmem:[#allocation2 + $0x220] sm:$0xff]  ;;  %v269_v1 = vld [vmem:[#allocation2 + $0x2a8] sm:$0xff] }
  0x2e   :  { %116 = vmatpush.msra.mxu1 %v50_v2  ;;  %204 = vmatpush.msra.mxu3 %v179_v4  ;;  %v356_v2 = vld [vmem:[#allocation2 + $0x3a0] sm:$0xff] }
  0x2f   :  { %324 = vmatpush.msrb.mxu2 %v323_v5  ;;  %871 = vset.pattern.permute.xlu2 %v946_v8  ;;  %v308_v4 = vld [vmem:[#allocation2 + $0x300] sm:$0xff]  ;;  %v223_v5 = vld [vmem:[#allocation2 + $0x218] sm:$0xff]  ;;  %v222_v8 = vld [vmem:[#allocation2 + $0x210] sm:$0xff] }
  0x30   :  { %98 = vmatpush.msra.mxu0 %v71_v6  ;;  %654 = vperm.xlu2 %871, %v987_v3   ;;  %v268_v6 = vld [vmem:[#allocation2 + $0x2a0] sm:$0xff] }
  0x31   :  { %117 = vmatpush.msra.mxu1 %v49_v7  ;;  %205 = vmatpush.msra.mxu3 %v178_v9  ;;  %v355_v7 = vld [vmem:[#allocation2 + $0x398] sm:$0xff] }
  0x32   :  { %325 = vmatpush.msrb.mxu2 %v322_v10  ;;  %99 = vmatpush.msra.mxu0 %v70_v12  ;;  %v267_v9 = vld [vmem:[#allocation2 + $0x298] sm:$0xff]  ;;  %v354_v10 = vld [vmem:[#allocation2 + $0x390] sm:$0xff] }
  0x33   :  { %118 = vmatpush.msra.mxu1 %v48_v13  ;;  %206 = vmatpush.msra.mxu3 %v177_v14  ;;  %v266_v12 = vld [vmem:[#allocation2 + $0x290] sm:$0xff]  ;;  %v353_v13 = vld [vmem:[#allocation2 + $0x388] sm:$0xff]  ;;  %v220_v14 = vld [vmem:[#allocation2 + $0x200] sm:$0xff] }
  0x34   :  { %873 = vset.pattern.permute.xlu1 %v947_v11  ;;  %326 = vmatpush.msrb.mxu2 %v321_v15  ;;  %v265_v15 = vld [vmem:[#allocation2 + $0x288] sm:$0xff] }
  0x35   :  { %698 = vperm.xlu1 %873, %v987_v3   ;;  %100 = vmatpush.msra.mxu0 %v69_v16  ;;  %v352_v16 = vld [vmem:[#allocation2 + $0x380] sm:$0xff] }
  0x36   :  { %119 = vmatpush.msra.mxu1 %v47_v17  ;;  %207 = vmatpush.msra.mxu3 %v176_v18  ;;  %v264_v17 = vld [vmem:[#allocation2 + $0x280] sm:$0xff]  ;;  %v38_v18 = vlaneseq }
  0x37   :  { %327 = vmatpush.msrb.mxu2 %v320_v19  ;;  %236 = vmatpush.msrb.mxu0 %v235_v20 }
  0x38   :  { %368 = vmatpush.msrb.mxu3 %v367_v21  ;;  %120 = vmatpush.msra.mxu1 %v46_v22  ;;  %v1007_v20 = vand.u32 127, %v38_v18  ;;  %v530_v18 = vld [vmem:[#allocation2 + $0x590] sm:$0xff] }
  0x39   :  { %328 = vmatpush.msrb.mxu2 %v319_v23  ;;  %237 = vmatpush.msrb.mxu0 %v234_v24  ;;  %v499_v23 = vld [vmem:[#allocation2 + $0x578] sm:$0xff] }
  0x3a   :  { %280 = vmatpush.msrb.mxu1 %v279_v25  ;;  %369 = vmatpush.msrb.mxu3 %v366_v26  ;;  %v543_v24 = vld [vmem:[#allocation2 + $0x5f8] sm:$0xff]  ;;  %v949_v25 = vmov 1.0   ;;  %v498_v26 = vld [vmem:[#allocation2 + $0x570] sm:$0xff] }
  0x3b   :  { %874 = vset.pattern.permute.xlu2 %v948_v30  ;;  %329 = vmatpush.msrb.mxu2 %v318_v27  ;;  %v542_v27 = vld [vmem:[#allocation2 + $0x5f0] sm:$0xff] }
  0x3c   :  { %610 = vperm.xlu2 %874, %v987_v3   ;;  %238 = vmatpush.msrb.mxu0 %v233_v28  ;;  %v362_v3 = vld [vmem:[#allocation2 + $0x3d0] sm:$0xff]  ;;  %v497_v28 = vld [vmem:[#allocation2 + $0x568] sm:$0xff] }
  0x3d   :  { %281 = vmatpush.msrb.mxu1 %v278_v29  ;;  %370 = vmatpush.msrb.mxu3 %v365_v31  ;;  %v541_v29 = vld [vmem:[#allocation2 + $0x5e8] sm:$0xff]  ;;  %v496_v31 = vld [vmem:[#allocation2 + $0x560] sm:$0xff] }
  0x3e   :  { %330 = vmatpush.msrb.mxu2 %v317_v32  ;;  %239 = vmatpush.msrb.mxu0 %v232_v33  ;;  %v540_v32 = vld [vmem:[#allocation2 + $0x5e0] sm:$0xff] }
  0x3f   :  { %282 = vmatpush.msrb.mxu1 %v277_v34  ;;  %371 = vmatpush.msrb.mxu3 %v364_v35  ;;  %v411_v35 = vld [vmem:[#allocation2 + $0x478] sm:$0xff] }
  0x40   :  { %331 = vmatpush.msrb.mxu2 %v316_v36  ;;  %240 = vmatpush.msrb.mxu0 %v231_v37  ;;  %v495_v36 = vld [vmem:[#allocation2 + $0x558] sm:$0xff] }
  0x41   :  { %283 = vmatpush.msrb.mxu1 %v276_v38  ;;  %372 = vmatpush.msrb.mxu3 %v363_v39  ;;  %v455_v37 = vld [vmem:[#allocation2 + $0x4f8] sm:$0xff]  ;;  %v410_v39 = vld [vmem:[#allocation2 + $0x470] sm:$0xff] }
  0x42   :  { %332 = vmatpush.msrb.mxu2 %v315_v40  ;;  %241 = vmatpush.msrb.mxu0 %v230_v41  ;;  %v539_v38 = vld [vmem:[#allocation2 + $0x5d8] sm:$0xff]  ;;  %v494_v40 = vld [vmem:[#allocation2 + $0x550] sm:$0xff] }
  0x43   :  { %284 = vmatpush.msrb.mxu1 %v275_v42  ;;  %373 = vmatpush.msrb.mxu3 %v362_v3  ;;  %v454_v41 = vld [vmem:[#allocation2 + $0x4f0] sm:$0xff]  ;;  %v409_v3 = vld [vmem:[#allocation2 + $0x468] sm:$0xff] }
  0x44   :  { %333 = vmatpush.msrb.mxu2 %v314_v43  ;;  %242 = vmatpush.msrb.mxu0 %v229_v44  ;;  %v538_v42 = vld [vmem:[#allocation2 + $0x5d0] sm:$0xff]  ;;  %v493_v43 = vld [vmem:[#allocation2 + $0x548] sm:$0xff] }
  0x45   :  { %285 = vmatpush.msrb.mxu1 %v274_v45  ;;  %374 = vmatpush.msrb.mxu3 %v361_v46  ;;  %v453_v44 = vld [vmem:[#allocation2 + $0x4e8] sm:$0xff]  ;;  %v408_v46 = vld [vmem:[#allocation2 + $0x460] sm:$0xff] }
  0x46   :  { %334 = vmatpush.msrb.mxu2 %v313_v47  ;;  %243 = vmatpush.msrb.mxu0 %v228_v48  ;;  %v537_v45 = vld [vmem:[#allocation2 + $0x5c8] sm:$0xff]  ;;  %v492_v47 = vld [vmem:[#allocation2 + $0x540] sm:$0xff] }
  0x47   :  { %286 = vmatpush.msrb.mxu1 %v273_v49  ;;  %375 = vmatpush.msrb.mxu3 %v360_v50  ;;  %v452_v49 = vld [vmem:[#allocation2 + $0x4e0] sm:$0xff]  ;;  %v407_v50 = vld [vmem:[#allocation2 + $0x458] sm:$0xff] }
  0x48   :  { %335 = vmatpush.msrb.mxu2 %v312_v51  ;;  %244 = vmatpush.msrb.mxu0 %v227_v52  ;;  %v491_v52 = vld [vmem:[#allocation2 + $0x538] sm:$0xff] }
  0x49   :  { %287 = vmatpush.msrb.mxu1 %v272_v53  ;;  %376 = vmatpush.msrb.mxu3 %v359_v54  ;;  %v406_v53 = vld [vmem:[#allocation2 + $0x450] sm:$0xff]  ;;  %v451_v54 = vld [vmem:[#allocation2 + $0x4d8] sm:$0xff] }
  0x4a   :  { %336 = vmatpush.msrb.mxu2 %v311_v55  ;;  %245 = vmatpush.msrb.mxu0 %v226_v56  ;;  %v490_v55 = vld [vmem:[#allocation2 + $0x530] sm:$0xff]  ;;  %v536_v56 = vld [vmem:[#allocation2 + $0x5c0] sm:$0xff] }
  0x4b   :  { %288 = vmatpush.msrb.mxu1 %v271_v57  ;;  %377 = vmatpush.msrb.mxu3 %v358_v58  ;;  %v405_v57 = vld [vmem:[#allocation2 + $0x448] sm:$0xff]  ;;  %v450_v58 = vld [vmem:[#allocation2 + $0x4d0] sm:$0xff] }
  0x4c   :  { %337 = vmatpush.msrb.mxu2 %v310_v59  ;;  %246 = vmatpush.msrb.mxu0 %v225_v60  ;;  %v489_v59 = vld [vmem:[#allocation2 + $0x528] sm:$0xff]  ;;  %v535_v60 = vld [vmem:[#allocation2 + $0x5b8] sm:$0xff] }
  0x4d   :  { %289 = vmatpush.msrb.mxu1 %v270_v61  ;;  %378 = vmatpush.msrb.mxu3 %v357_v62  ;;  %v404_v61 = vld [vmem:[#allocation2 + $0x440] sm:$0xff]  ;;  %v449_v62 = vld [vmem:[#allocation2 + $0x4c8] sm:$0xff] }
  0x4e   :  { %875 = vset.pattern.permute.xlu0 %v947_v11  ;;  %338 = vmatpush.msrb.mxu2 %v309_v63  ;;  %v221_v11 = vld [vmem:[#allocation2 + $0x208] sm:$0xff]  ;;  %v488_v63 = vld [vmem:[#allocation2 + $0x520] sm:$0xff] }
  0x4f   :  { %247 = vmatpush.msrb.mxu0 %v224_v0  ;;  %290 = vmatpush.msrb.mxu1 %v269_v1  ;;  %v534_v0 = vld [vmem:[#allocation2 + $0x5b0] sm:$0xff]  ;;  %v403_v1 = vld [vmem:[#allocation2 + $0x438] sm:$0xff] }
  0x50   :  { %379 = vmatpush.msrb.mxu3 %v356_v2  ;;  %339 = vmatpush.msrb.mxu2 %v308_v4  ;;  %v448_v2 = vld [vmem:[#allocation2 + $0x4c0] sm:$0xff]  ;;  %v487_v4 = vld [vmem:[#allocation2 + $0x518] sm:$0xff] }
  0x51   :  { %248 = vmatpush.msrb.mxu0 %v223_v5  ;;  %291 = vmatpush.msrb.mxu1 %v268_v6  ;;  %v533_v5 = vld [vmem:[#allocation2 + $0x5a8] sm:$0xff]  ;;  %v402_v6 = vld [vmem:[#allocation2 + $0x430] sm:$0xff] }
  0x52   :  { %380 = vmatpush.msrb.mxu3 %v355_v7  ;;  %v447_v7 = vld [vmem:[#allocation2 + $0x4b8] sm:$0xff] }
  0x53   :  { %249 = vmatpush.msrb.mxu0 %v222_v8  ;;  %292 = vmatpush.msrb.mxu1 %v267_v9  ;;  %v486_v8 = vld [vmem:[#allocation2 + $0x510] sm:$0xff]  ;;  %v532_v9 = vld [vmem:[#allocation2 + $0x5a0] sm:$0xff] }
  0x54   :  { %381 = vmatpush.msrb.mxu3 %v354_v10  ;;  %v401_v10 = vld [vmem:[#allocation2 + $0x428] sm:$0xff] }
  0x55   :  { %250 = vmatpush.msrb.mxu0 %v221_v11  ;;  %293 = vmatpush.msrb.mxu1 %v266_v12  ;;  %v446_v11 = vld [vmem:[#allocation2 + $0x4b0] sm:$0xff]  ;;  %v485_v12 = vld [vmem:[#allocation2 + $0x508] sm:$0xff] }
  0x56   :  { %382 = vmatpush.msrb.mxu3 %v353_v13 }
  0x57   :  { %251 = vmatpush.msrb.mxu0 %v220_v14  ;;  %294 = vmatpush.msrb.mxu1 %v265_v15  ;;  %v531_v14 = vld [vmem:[#allocation2 + $0x598] sm:$0xff]  ;;  %v400_v15 = vld [vmem:[#allocation2 + $0x420] sm:$0xff] }
  0x58   :  { %383 = vmatpush.msrb.mxu3 %v352_v16  ;;  %v445_v16 = vld [vmem:[#allocation2 + $0x4a8] sm:$0xff] }
  0x59   :  { %295 = vmatpush.msrb.mxu1 %v264_v17  ;;  %v484_v17 = vld [vmem:[#allocation2 + $0x500] sm:$0xff] }
  0x63   :  { %v303_v19 = vpop.permute.xlu2 %302 }
  0x64   :  { %vm304_vm2 = vcmp.eq.s32.totalorder %v303_v19, %v1007_v20  ;;  %v399_v19 = vld [vmem:[#allocation2 + $0x418] sm:$0xff] }
  0x6d   :  { %v215_v30 = vpop.permute.xlu2 %214 }
  0x6e   :  { %vm216_vm5 = vcmp.eq.s32.totalorder %v215_v30, %v1007_v20  ;;  %v528_v30 = vld [vmem:[#allocation2 + $0x580] sm:$0xff] }
  0x76   :  { %v259_v48 = vpop.permute.xlu2 %258 }
  0x77   :  { %vm260_vm6 = vcmp.eq.s32.totalorder %v259_v48, %v1007_v20  ;;  %v669_v48 = vld [vmem:[#allocation2 + $0x748] sm:$0xff] }
  0x7a   :  { %v171_v22 = vpop.permute.xlu1 %170 }
  0x7b   :  { %v127_v21 = vpop.permute.xlu0 %126  ;;  %vm172_vm1 = vcmp.eq.s32.totalorder %v171_v22, %v1007_v20  ;;  %v675_v22 = vld [vmem:[#allocation2 + $0x778] sm:$0xff] }
  0x7c   :  { %vm128_vm0 = vcmp.eq.s32.totalorder %v127_v21, %v1007_v20  ;;  %813 = vmatmul.msk.f32.vlgmr.msra.gmra.mxu3 %vm172_vm1, %v949_v25  ;;  %v444_v21 = vld [vmem:[#allocation2 + $0x4a0] sm:$0xff] }
  0x7d   :  { %811 = vmatmul.msk.f32.vlgmr.msra.gmra.mxu2 %vm128_vm0, %v949_v25  ;;  %544 = vmatpush.msra.mxu3 %v543_v24  ;;  %v398_v24 = vld [vmem:[#allocation2 + $0x410] sm:$0xff]  ;;  %vm787_vm0 = vcmask 60416  }
  0x7e   :  { %500 = vmatpush.msra.mxu2 %v499_v23  ;;  %v529_v23 = vld [vmem:[#allocation2 + $0x588] sm:$0xff] }
  0x7f   :  { %545 = vmatpush.msra.mxu3 %v542_v27  ;;  %v523_v27 = vpop.permute.xlu2 %522 }
  0x80   :  { %501 = vmatpush.msra.mxu2 %v498_v26  ;;  %v443_v26 = vld [vmem:[#allocation2 + $0x498] sm:$0xff]  ;;  %vm524_vm8 = vcmp.eq.s32.totalorder %v523_v27, %v1007_v20 }
  0x81   :  { %546 = vmatpush.msra.mxu3 %v541_v29  ;;  %v707_v27 = vld [vmem:[#allocation2 + $0x798] sm:$0xff] }
  0x82   :  { %502 = vmatpush.msra.mxu2 %v497_v28  ;;  %v674_v28 = vld [vmem:[#allocation2 + $0x770] sm:$0xff] }
  0x83   :  { %v42_v33 = vpop.permute.xlu1 %41  ;;  %547 = vmatpush.msra.mxu3 %v540_v32  ;;  %v442_v32 = vld [vmem:[#allocation2 + $0x490] sm:$0xff] }
  0x84   :  { %v64_v34 = vpop.permute.xlu0 %63  ;;  %503 = vmatpush.msra.mxu2 %v496_v31  ;;  %vm43_vm3 = vcmp.eq.s32.totalorder %v42_v33, %v1007_v20  ;;  %v397_v31 = vld [vmem:[#allocation2 + $0x408] sm:$0xff] }
  0x85   :  { %vm65_vm4 = vcmp.eq.s32.totalorder %v64_v34, %v1007_v20  ;;  %819 = vmatmul.msk.f32.vlgmr.msrb.gmra.mxu2 %vm304_vm2, %v949_v25  ;;  %809 = vmatmul.msk.f32.vlgmr.msra.gmra.mxu1 %vm43_vm3, %v949_v25  ;;  %v673_v33 = vld [vmem:[#allocation2 + $0x768] sm:$0xff]  ;;  %v396_v34 = vld [vmem:[#allocation2 + $0x400] sm:$0xff] }
  0x86   :  { %808 = vmatmul.msk.f32.vlgmr.msra.gmra.mxu0 %vm65_vm4, %v949_v25  ;;  %504 = vmatpush.msra.mxu2 %v495_v36  ;;  %v672_v36 = vld [vmem:[#allocation2 + $0x760] sm:$0xff] }
  0x87   :  { %412 = vmatpush.msra.mxu0 %v411_v35  ;;  %456 = vmatpush.msra.mxu1 %v455_v37  ;;  %v441_v35 = vld [vmem:[#allocation2 + $0x488] sm:$0xff] }
  0x88   :  { %548 = vmatpush.msra.mxu3 %v539_v38  ;;  %505 = vmatpush.msra.mxu2 %v494_v40  ;;  %v719_v38 = vld [vmem:[#allocation2 + $0x7f8] sm:$0xff]  ;;  %v440_v40 = vld [vmem:[#allocation2 + $0x480] sm:$0xff] }
  0x89   :  { %413 = vmatpush.msra.mxu0 %v410_v39  ;;  %457 = vmatpush.msra.mxu1 %v454_v41  ;;  %v587_v39 = vld [vmem:[#allocation2 + $0x678] sm:$0xff] }
  0x8a   :  { %549 = vmatpush.msra.mxu3 %v538_v42  ;;  %506 = vmatpush.msra.mxu2 %v493_v43  ;;  %v671_v41 = vld [vmem:[#allocation2 + $0x758] sm:$0xff]  ;;  %v586_v42 = vld [vmem:[#allocation2 + $0x670] sm:$0xff] }
  0x8b   :  { %414 = vmatpush.msra.mxu0 %v409_v3  ;;  %458 = vmatpush.msra.mxu1 %v453_v44  ;;  %v631_v3 = vld [vmem:[#allocation2 + $0x6f8] sm:$0xff]  ;;  %v718_v43 = vld [vmem:[#allocation2 + $0x7f0] sm:$0xff] }
  0x8c   :  { %550 = vmatpush.msra.mxu3 %v537_v45  ;;  %v347_v51 = vpop.permute.xlu1 %346  ;;  %507 = vmatpush.msra.mxu2 %v492_v47  ;;  %v670_v44 = vld [vmem:[#allocation2 + $0x750] sm:$0xff]  ;;  %v585_v45 = vld [vmem:[#allocation2 + $0x668] sm:$0xff] }
  0x8d   :  { %415 = vmatpush.msra.mxu0 %v408_v46  ;;  %vm348_vm7 = vcmp.eq.s32.totalorder %v347_v51, %v1007_v20  ;;  %459 = vmatpush.msra.mxu1 %v452_v49  ;;  %v479_v29 = vpop.permute.xlu0 %478  ;;  %v630_v46 = vld [vmem:[#allocation2 + $0x6f0] sm:$0xff]  ;;  %v717_v47 = vld [vmem:[#allocation2 + $0x7e8] sm:$0xff]  ;;  %v584_v49 = vld [vmem:[#allocation2 + $0x660] sm:$0xff] }
  0x8e   :  { %815 = vmatmul.msk.f32.vlgmr.msrb.gmra.mxu0 %vm216_vm5, %v949_v25  ;;  %821 = vmatmul.msk.f32.vlgmr.msrb.gmra.mxu3 %vm348_vm7, %v949_v25  ;;  %vm480_vm9 = vcmp.eq.s32.totalorder %v479_v29, %v1007_v20  ;;  %v716_v51 = vld [vmem:[#allocation2 + $0x7e0] sm:$0xff]  ;;  %v619_v29 = vld [vmem:[#allocation2 + $0x698] sm:$0xff] }
  0x8f   :  { %416 = vmatpush.msra.mxu0 %v407_v50  ;;  %508 = vmatpush.msra.mxu2 %v491_v52  ;;  %v629_v50 = vld [vmem:[#allocation2 + $0x6e8] sm:$0xff]  ;;  %v668_v52 = vld [vmem:[#allocation2 + $0x740] sm:$0xff] }
  0x90   :  { %817 = vmatmul.msk.f32.vlgmr.msrb.gmra.mxu1 %vm260_vm6, %v949_v25  ;;  %551 = vmatpush.msra.mxu3 %v536_v56  ;;  %v667_v56 = vld [vmem:[#allocation2 + $0x738] sm:$0xff] }
  0x91   :  { %417 = vmatpush.msra.mxu0 %v406_v53  ;;  %460 = vmatpush.msra.mxu1 %v451_v54  ;;  %v583_v53 = vld [vmem:[#allocation2 + $0x658] sm:$0xff]  ;;  %v628_v54 = vld [vmem:[#allocation2 + $0x6e0] sm:$0xff] }
  0x92   :  { %509 = vmatpush.msra.mxu2 %v490_v55  ;;  %552 = vmatpush.msra.mxu3 %v535_v60  ;;  %v715_v55 = vld [vmem:[#allocation2 + $0x7d8] sm:$0xff]  ;;  %v666_v60 = vld [vmem:[#allocation2 + $0x730] sm:$0xff] }
  0x93   :  { %418 = vmatpush.msra.mxu0 %v405_v57  ;;  %461 = vmatpush.msra.mxu1 %v450_v58  ;;  %v582_v57 = vld [vmem:[#allocation2 + $0x650] sm:$0xff]  ;;  %v627_v58 = vld [vmem:[#allocation2 + $0x6d8] sm:$0xff] }
  0x94   :  { %510 = vmatpush.msra.mxu2 %v489_v59  ;;  %553 = vmatpush.msra.mxu3 %v534_v0  ;;  %v714_v59 = vld [vmem:[#allocation2 + $0x7d0] sm:$0xff]  ;;  %v665_v0 = vld [vmem:[#allocation2 + $0x728] sm:$0xff] }
  0x95   :  { %419 = vmatpush.msra.mxu0 %v404_v61  ;;  %462 = vmatpush.msra.mxu1 %v449_v62  ;;  %v391_v13 = vpop.permute.xlu1 %390  ;;  %v581_v61 = vld [vmem:[#allocation2 + $0x648] sm:$0xff]  ;;  %v626_v62 = vld [vmem:[#allocation2 + $0x6d0] sm:$0xff] }
  0x96   :  { %511 = vmatpush.msra.mxu2 %v488_v63  ;;  %554 = vmatpush.msra.mxu3 %v533_v5  ;;  %vm392_vm10 = vcmp.eq.s32.totalorder %v391_v13, %v1007_v20  ;;  %v713_v63 = vld [vmem:[#allocation2 + $0x7c8] sm:$0xff]  ;;  %v664_v5 = vld [vmem:[#allocation2 + $0x720] sm:$0xff]  ;;  %v662_v13 = vld [vmem:[#allocation2 + $0x710] sm:$0xff] }
  0x97   :  { %420 = vmatpush.msra.mxu0 %v403_v1  ;;  %463 = vmatpush.msra.mxu1 %v448_v2  ;;  %v580_v1 = vld [vmem:[#allocation2 + $0x640] sm:$0xff]  ;;  %v625_v2 = vld [vmem:[#allocation2 + $0x6c8] sm:$0xff] }
  0x98   :  { %512 = vmatpush.msra.mxu2 %v487_v4  ;;  %555 = vmatpush.msra.mxu3 %v532_v9  ;;  %v712_v4 = vld [vmem:[#allocation2 + $0x7c0] sm:$0xff]  ;;  %v663_v9 = vld [vmem:[#allocation2 + $0x718] sm:$0xff] }
  0x99   :  { %421 = vmatpush.msra.mxu0 %v402_v6  ;;  %464 = vmatpush.msra.mxu1 %v447_v7  ;;  %v579_v6 = vld [vmem:[#allocation2 + $0x638] sm:$0xff]  ;;  %v624_v7 = vld [vmem:[#allocation2 + $0x6c0] sm:$0xff] }
  0x9a   :  { %513 = vmatpush.msra.mxu2 %v486_v8  ;;  %556 = vmatpush.msra.mxu3 %v531_v14  ;;  %v711_v8 = vld [vmem:[#allocation2 + $0x7b8] sm:$0xff]  ;;  %v577_v14 = vld [vmem:[#allocation2 + $0x628] sm:$0xff] }
  0x9b   :  { %422 = vmatpush.msra.mxu0 %v401_v10  ;;  %465 = vmatpush.msra.mxu1 %v446_v11  ;;  %v578_v10 = vld [vmem:[#allocation2 + $0x630] sm:$0xff]  ;;  %v623_v11 = vld [vmem:[#allocation2 + $0x6b8] sm:$0xff] }
  0x9c   :  { %514 = vmatpush.msra.mxu2 %v485_v12  ;;  %557 = vmatpush.msra.mxu3 %v530_v18  ;;  %v710_v12 = vld [vmem:[#allocation2 + $0x7b0] sm:$0xff]  ;;  %v661_v18 = vld [vmem:[#allocation2 + $0x708] sm:$0xff] }
  0x9d   :  { %423 = vmatpush.msra.mxu0 %v400_v15  ;;  %466 = vmatpush.msra.mxu1 %v445_v16  ;;  %v622_v15 = vld [vmem:[#allocation2 + $0x6b0] sm:$0xff]  ;;  %v655_v16 = vpop.permute.xlu2 %654 }
  0x9e   :  { %515 = vmatpush.msra.mxu2 %v484_v17  ;;  %558 = vmatpush.msra.mxu3 %v529_v23  ;;  %v435_v37 = vpop.permute.xlu1 %434  ;;  %v709_v17 = vld [vmem:[#allocation2 + $0x7a8] sm:$0xff]  ;;  %v660_v23 = vld [vmem:[#allocation2 + $0x700] sm:$0xff]  ;;  %vm656_vm12 = vcmp.eq.s32.totalorder %v655_v16, %v1007_v20 }
  0x9f   :  { %424 = vmatpush.msra.mxu0 %v399_v19  ;;  %467 = vmatpush.msra.mxu1 %v444_v21  ;;  %vm436_vm11 = vcmp.eq.s32.totalorder %v435_v37, %v1007_v20  ;;  %v576_v19 = vld [vmem:[#allocation2 + $0x620] sm:$0xff]  ;;  %v621_v21 = vld [vmem:[#allocation2 + $0x6a8] sm:$0xff] }
  0xa0   :  { %676 = vmatpush.msrb.mxu2 %v675_v22  ;;  %559 = vmatpush.msra.mxu3 %v528_v30  ;;  %v708_v22 = vld [vmem:[#allocation2 + $0x7a0] sm:$0xff]  ;;  %v706_v30 = vld [vmem:[#allocation2 + $0x790] sm:$0xff]  ;;  %v617_v37 = vld [vmem:[#allocation2 + $0x688] sm:$0xff] }
  0xa1   :  { %425 = vmatpush.msra.mxu0 %v398_v24  ;;  %468 = vmatpush.msra.mxu1 %v443_v26  ;;  %v575_v24 = vld [vmem:[#allocation2 + $0x618] sm:$0xff]  ;;  %v620_v26 = vld [vmem:[#allocation2 + $0x6a0] sm:$0xff] }
  0xa2   :  { %677 = vmatpush.msrb.mxu2 %v674_v28  ;;  %829 = vmatmul.msk.f32.vlgmr.msra.gmra.mxu3 %vm524_vm8, %v949_v25  ;;  %v574_v28 = vld [vmem:[#allocation2 + $0x610] sm:$0xff] }
  0xa3   :  { %426 = vmatpush.msra.mxu0 %v397_v31  ;;  %469 = vmatpush.msra.mxu1 %v442_v32  ;;  %v573_v31 = vld [vmem:[#allocation2 + $0x608] sm:$0xff]  ;;  %v618_v32 = vld [vmem:[#allocation2 + $0x690] sm:$0xff] }
  0xa4   :  { %678 = vmatpush.msrb.mxu2 %v673_v33  ;;  %720 = vmatpush.msrb.mxu3 %v719_v38  ;;  %v567_v33 = vpop.permute.xlu0 %566 }
  0xa5   :  { %827 = vmatmul.msk.f32.vlgmr.msra.gmra.mxu2 %vm480_vm9, %v949_v25  ;;  %427 = vmatpush.msra.mxu0 %v396_v34  ;;  %v705_v34 = vld [vmem:[#allocation2 + $0x788] sm:$0xff]  ;;  %v611_v38 = vpop.permute.xlu2 %610  ;;  %vm568_vm13 = vcmp.eq.s32.totalorder %v567_v33, %v1007_v20 }
  0xa6   :  { %470 = vmatpush.msra.mxu1 %v441_v35  ;;  %679 = vmatpush.msrb.mxu2 %v672_v36  ;;  %v572_v36 = vld [vmem:[#allocation2 + $0x600] sm:$0xff]  ;;  %vm612_vm15 = vcmp.eq.s32.totalorder %v611_v38, %v1007_v20 }
  0xa7   :  { %823 = vmatmul.msk.f32.vlgmr.msra.gmra.mxu0 %vm392_vm10, %v949_v25  ;;  %721 = vmatpush.msrb.mxu3 %v718_v43  ;;  %v699_v35 = vpop.permute.xlu1 %698  ;;  %v757_v43 = vld [vmem:[%s1101_s3 + $0x50] sm:$0xff] }
  0xa8   :  { %588 = vmatpush.msrb.mxu0 %v587_v39  ;;  %471 = vmatpush.msra.mxu1 %v440_v40  ;;  %v704_v39 = vld [vmem:[#allocation2 + $0x780] sm:$0xff]  ;;  %vm700_vm14 = vcmp.eq.s32.totalorder %v699_v35, %v1007_v20  ;;  %v760_v20 = vld [vmem:[%s1101_s3 + $0x68] sm:$0xff] }
  0xa9   :  { %680 = vmatpush.msrb.mxu2 %v671_v41  ;;  %825 = vmatmul.msk.f32.vlgmr.msra.gmra.mxu1 %vm436_vm11, %v949_v25  ;;  %v616_v40 = vld [vmem:[#allocation2 + $0x680] sm:$0xff]  ;;  %v762_v41 = vld [vmem:[%s1101_s3 + $0x78] sm:$0xff] }
  0xaa   :  { %589 = vmatpush.msrb.mxu0 %v586_v42  ;;  %632 = vmatpush.msrb.mxu1 %v631_v3  ;;  %v761_v42 = vld [vmem:[%s1101_s3 + $0x70] sm:$0xff]  ;;  %v759_v3 = vld [vmem:[%s1101_s3 + $0x60] sm:$0xff] }
  0xab   :  { %681 = vmatpush.msrb.mxu2 %v670_v44  ;;  %722 = vmatpush.msrb.mxu3 %v717_v47  ;;  %v756_v44 = vld [vmem:[%s1101_s3 + $0x48] sm:$0xff] }
  0xac   :  { %590 = vmatpush.msrb.mxu0 %v585_v45  ;;  %633 = vmatpush.msrb.mxu1 %v630_v46  ;;  %v755_v45 = vld [vmem:[%s1101_s3 + $0x40] sm:$0xff]  ;;  %v754_v46 = vld [vmem:[%s1101_s3 + $0x38] sm:$0xff] }
  0xad   :  { %682 = vmatpush.msrb.mxu2 %v669_v48  ;;  %723 = vmatpush.msrb.mxu3 %v716_v51 }
  0xae   :  { %591 = vmatpush.msrb.mxu0 %v584_v49  ;;  %634 = vmatpush.msrb.mxu1 %v629_v50 }
  0xaf   :  { %683 = vmatpush.msrb.mxu2 %v668_v52  ;;  %724 = vmatpush.msrb.mxu3 %v715_v55  ;;  %v753_v52 = vld [vmem:[%s1101_s3 + $0x30] sm:$0xff]  ;;  %v752_v55 = vld [vmem:[%s1101_s3 + $0x28] sm:$0xff] }
  0xb0   :  { %592 = vmatpush.msrb.mxu0 %v583_v53  ;;  %635 = vmatpush.msrb.mxu1 %v628_v54 }
  0xb1   :  { %684 = vmatpush.msrb.mxu2 %v667_v56  ;;  %725 = vmatpush.msrb.mxu3 %v714_v59 }
  0xb2   :  { %593 = vmatpush.msrb.mxu0 %v582_v57  ;;  %636 = vmatpush.msrb.mxu1 %v627_v58  ;;  %v751_v57 = vld [vmem:[%s1101_s3 + $0x20] sm:$0xff] }
  0xb3   :  { %685 = vmatpush.msrb.mxu2 %v666_v60  ;;  %726 = vmatpush.msrb.mxu3 %v713_v63  ;;  %v750_v60 = vld [vmem:[%s1101_s3 + $0x18] sm:$0xff] }
  0xb4   :  { %594 = vmatpush.msrb.mxu0 %v581_v61  ;;  %637 = vmatpush.msrb.mxu1 %v626_v62  ;;  %v749_v61 = vld [vmem:[%s1101_s3 + $0x10] sm:$0xff] }
  0xb5   :  { %686 = vmatpush.msrb.mxu2 %v665_v0  ;;  %727 = vmatpush.msrb.mxu3 %v712_v4  ;;  %v748_v0 = vld [vmem:[%s1101_s3 + $0x8] sm:$0xff] }
  0xb6   :  { %595 = vmatpush.msrb.mxu0 %v580_v1  ;;  %638 = vmatpush.msrb.mxu1 %v625_v2  ;;  %v747_v1 = vld [vmem:[%s1101_s3] sm:$0xff] }
  0xb7   :  { %687 = vmatpush.msrb.mxu2 %v664_v5  ;;  %728 = vmatpush.msrb.mxu3 %v711_v8 }
  0xb8   :  { %596 = vmatpush.msrb.mxu0 %v579_v6  ;;  %639 = vmatpush.msrb.mxu1 %v624_v7 }
  0xb9   :  { %688 = vmatpush.msrb.mxu2 %v663_v9  ;;  %729 = vmatpush.msrb.mxu3 %v710_v12 }
  0xba   :  { %597 = vmatpush.msrb.mxu0 %v578_v10  ;;  %640 = vmatpush.msrb.mxu1 %v623_v11 }
  0xbb   :  { %689 = vmatpush.msrb.mxu2 %v662_v13  ;;  %730 = vmatpush.msrb.mxu3 %v709_v17 }
  0xbc   :  { %598 = vmatpush.msrb.mxu0 %v577_v14  ;;  %641 = vmatpush.msrb.mxu1 %v622_v15 }
  0xbd   :  { %690 = vmatpush.msrb.mxu2 %v661_v18  ;;  %731 = vmatpush.msrb.mxu3 %v708_v22 }
  0xbe   :  { %599 = vmatpush.msrb.mxu0 %v576_v19  ;;  %642 = vmatpush.msrb.mxu1 %v621_v21  ;;  %v876_v21 = vld [vmem:[%s1100_s2] ss:$0 sm:$0xff] }
  0xbf   :  { %691 = vmatpush.msrb.mxu2 %v660_v23  ;;  %732 = vmatpush.msrb.mxu3 %v707_v27  ;;  %v877_v27 = vld [vmem:[%s1102_s4] ss:$0 sm:$0xff] }
  0xc0   :  { %600 = vmatpush.msrb.mxu0 %v575_v24  ;;  %643 = vmatpush.msrb.mxu1 %v620_v26 }
  0xc1   :  { %835 = vmatmul.msk.f32.vlgmr.msrb.gmra.mxu2 %vm656_vm12, %v949_v25  ;;  %733 = vmatpush.msrb.mxu3 %v706_v30 }
  0xc2   :  { %601 = vmatpush.msrb.mxu0 %v574_v28  ;;  %644 = vmatpush.msrb.mxu1 %v619_v29 }
  0xc3   :  { %734 = vmatpush.msrb.mxu3 %v705_v34 }
  0xc4   :  { %602 = vmatpush.msrb.mxu0 %v573_v31  ;;  %645 = vmatpush.msrb.mxu1 %v618_v32 }
  0xc5   :  { %735 = vmatpush.msrb.mxu3 %v704_v39 }
  0xc6   :  { %603 = vmatpush.msrb.mxu0 %v572_v36  ;;  %646 = vmatpush.msrb.mxu1 %v617_v37 }
  0xc7   :  { %831 = vmatmul.msk.f32.vlgmr.msrb.gmra.mxu0 %vm568_vm13, %v949_v25  ;;  %837 = vmatmul.msk.f32.vlgmr.msrb.gmra.mxu3 %vm700_vm14, %v949_v25 }
  0xc8   :  { %647 = vmatpush.msrb.mxu1 %v616_v40  ;;  %767 = vmatpush.msra.mxu0 %v762_v41 }
  0xc9   :  { %833 = vmatmul.msk.f32.vlgmr.msrb.gmra.mxu1 %vm612_vm15, %v949_v25  ;;  %v758_v25 = vld [vmem:[%s1101_s3 + $0x58] sm:$0xff] }
  0xca   :  { %768 = vmatpush.msra.mxu0 %v761_v42 }
  0xcc   :  { %769 = vmatpush.msra.mxu0 %v760_v20 }
  0xce   :  { %770 = vmatpush.msra.mxu0 %v759_v3 }
  0xd0   :  { %771 = vmatpush.msra.mxu0 %v758_v25 }
  0xd2   :  { %772 = vmatpush.msra.mxu0 %v757_v43 }
  0xd4   :  { %773 = vmatpush.msra.mxu0 %v756_v44 }
  0xd6   :  { %774 = vmatpush.msra.mxu0 %v755_v45 }
  0xd8   :  { %775 = vmatpush.msra.mxu0 %v754_v46 }
  0xda   :  { %776 = vmatpush.msra.mxu0 %v753_v52 }
  0xdc   :  { %777 = vmatpush.msra.mxu0 %v752_v55 }
  0xde   :  { %778 = vmatpush.msra.mxu0 %v751_v57 }
  0xe0   :  { %779 = vmatpush.msra.mxu0 %v750_v60 }
  0xe2   :  { %780 = vmatpush.msra.mxu0 %v749_v61 }
  0xe4   :  { %781 = vmatpush.msra.mxu0 %v748_v0 }
  0xe6   :  { %782 = vmatpush.msra.mxu0 %v747_v1 }
  0xff   :  { %v209_v53 = vpop.f32.mrf.mxu3 }
 0x100   :  { %v165_v50 = vpop.f32.mrf.mxu2 }
 0x102   :  { %v122_v48 = vpop.f32.mrf.mxu1 }
 0x103   :  { %v102_v47 = vpop.f32.mrf.mxu0 }
 0x104   :  { %v123_v49 = vadd.f32 %v122_v48, %v102_v47 }
 0x106   :  { %v168_v51 = vadd.f32 %v165_v50, %v123_v49 }
 0x108   :  { %v212_v56 = vadd.f32 %v209_v53, %v168_v51  ;;  %v341_v63 = vpop.f32.mrf.mxu2 }
 0x10b   :  { %v253_v54 = vpop.f32.mrf.mxu0 }
 0x10c   :  { %v256_v58 = vadd.f32 %v253_v54, %v212_v56 }
 0x10d   :  { %v297_v59 = vpop.f32.mrf.mxu1 }
 0x10e   :  { %v300_v62 = vadd.f32 %v297_v59, %v256_v58 }
 0x110   :  { %v344_v2 = vadd.f32 %v341_v63, %v300_v62 }
 0x111   :  { %v385_v4 = vpop.f32.mrf.mxu3 }
 0x112   :  { %v388_v6 = vadd.f32 %v385_v4, %v344_v2 }
 0x124   :  { %v429_v5 = vpop.f32.mrf.mxu0 }
 0x125   :  { %v432_v7 = vadd.f32 %v429_v5, %v388_v6  ;;  %v561_v12 = vpop.f32.mrf.mxu3 }
 0x126   :  { %v473_v8 = vpop.f32.mrf.mxu1 }
 0x127   :  { %v476_v9 = vadd.f32 %v473_v8, %v432_v7 }
 0x128   :  { %v517_v10 = vpop.f32.mrf.mxu2 }
 0x129   :  { %v520_v11 = vadd.f32 %v517_v10, %v476_v9 }
 0x12b   :  { %v564_v13 = vadd.f32 %v561_v12, %v520_v11 }
 0x144   :  { %v605_v14 = vpop.f32.mrf.mxu0  ;;  %v693_v18 = vpop.f32.mrf.mxu2 }
 0x145   :  { %v608_v15 = vadd.f32 %v605_v14, %v564_v13 }
 0x146   :  { %v649_v16 = vpop.f32.mrf.mxu1 }
 0x147   :  { %v652_v17 = vadd.f32 %v649_v16, %v608_v15 }
 0x149   :  { %v696_v19 = vadd.f32 %v693_v18, %v652_v17 }
 0x14a   :  { %v737_v22 = vpop.f32.mrf.mxu3 }
 0x14b   :  { %v740_v23 = vadd.f32 %v737_v22, %v696_v19 }
 0x14d   :  { %v745_v24 = vadd.f32 %v876_v21, %v740_v23 }
 0x14f   :  { %v746_v26 = vmax.f32 %v745_v24, 0.0 }
 0x151   :  { %783 = vmatmul.f32.vlgmr.msra.gmra.mxu0 %v746_v26 }
 0x1ce   :  { %v784_v28 = vpop.f32.mrf.mxu0 }
 0x1cf   :  { %v785_v29 = vadd.f32 %v877_v27, %v784_v28 }
 0x1d1   :  { %788 = vst.msk [vmem:[#allocation5] sm:$0xf] %vm787_vm0, %v785_v29 }
 0x1d2   :  { %799 = dma.vmem_to_hbm [thread:$0]  %s795_s9, 64, %s797_s12, [#allocation4]  }
 0x1d3   :  { %928 = dma.done.wait [#allocation4], 64  }
 0x1d4   :  { %929 = vsyncadd [#allocation4], 4294967232 }
 0x1d5   :  { %804 = vsyncpa [#allocation3], 1 }
 0x1d6   :  { %805 = vsyncpa [#allocation4], 1 }

</bundles_post_ra>
